<compile_context>
chip_gen: v7x
topology: tpu7x:2x2x1
jax: 0.10.0
libtpu: 0.0.40
codegen_flags: <defaults>
</compile_context>

<pallas_src>
import functools

import jax
import jax.numpy as jnp
from jax import lax
from jax.experimental import pallas as pl
from jax.experimental.pallas import tpu as pltpu


# ---------------------------------------------------------------------------
# Generation-aware VMEM budgets (v5e/v6e: 128 MiB, v7x: 64 MiB per TC).
# ---------------------------------------------------------------------------
def _vmem_capacity_bytes():
    try:
        info = pltpu.get_tpu_info()
        cap = int(getattr(info, "vmem_capacity_bytes", 0) or 0)
        if cap > 0:
            return cap
    except Exception:
        pass
    return 64 * 1024 * 1024            # conservative fallback (v7x per-TC size)


_VMEM_CAP = _vmem_capacity_bytes()
# Limit handed to the compiler (leave headroom for its own scratch).
_VMEM_LIMIT = int(min(_VMEM_CAP * 0.75, 100 * 1024 * 1024))
# Budget used when sizing our own (double-buffered) blocks + scratch.
_TILE_BUDGET = int(min(_VMEM_CAP * 0.55, 72 * 1024 * 1024))


def _tile(dim, target, align):
    """Largest block size <= target that divides `dim` and is a multiple of
    `align`; falls back to the full dim (full-dim blocks are always legal
    under the (8,128) tiling rule)."""
    if dim <= target:
        return dim
    target = max(target, align)
    t = (target // align) * align
    while t >= align:
        if dim % t == 0:
            return t
        t -= align
    return dim


# ---------------------------------------------------------------------------
# Kernel 1: fused multi-output dense projection  y_i = x @ W_i + b_i
#   One pallas_call computes all outputs, sharing every read of x (fused QKV,
#   fused KV).  Weights are pre-transposed to (K, N) on the host.
# ---------------------------------------------------------------------------
def _proj_kernel_fullk(n, x_ref, *refs):
    """Full-K contraction: 2-D grid, no accumulator scratch."""
    w_refs = refs[:n]
    b_refs = refs[n:2 * n]
    o_refs = refs[2 * n:3 * n]
    x = x_ref[...]
    for w, b, o in zip(w_refs, b_refs, o_refs):
        o[...] = (jnp.dot(x, w[...], preferred_element_type=jnp.float32)
                  + b[...]).astype(o.dtype)


def _proj_kernel_tiledk(n, x_ref, *refs):
    """K-tiled contraction with f32 VMEM accumulators (large K fallback)."""
    w_refs = refs[:n]
    b_refs = refs[n:2 * n]
    o_refs = refs[2 * n:3 * n]
    acc_refs = refs[3 * n:]
    kk = pl.program_id(2)

    @pl.when(kk == 0)
    def _():
        for a in acc_refs:
            a[...] = jnp.zeros_like(a)

    x = x_ref[...]
    for w, a in zip(w_refs, acc_refs):
        a[...] += jnp.dot(x, w[...], preferred_element_type=jnp.float32)

    @pl.when(kk == pl.num_programs(2) - 1)
    def _():
        for a, b, o in zip(acc_refs, b_refs, o_refs):
            o[...] = (a[...] + b[...]).astype(o.dtype)


def _choose_linear_tiles(M, K, N_each, n_out, in_bytes, out_bytes, budget, m_align):
    def usage(tm, tn, tk, with_acc):
        b = 2 * tm * tk * in_bytes                   # x (double-buffered)
        b += 2 * n_out * tk * tn * in_bytes          # weights
        b += 2 * n_out * tn * 4                      # biases
        b += 2 * n_out * tm * tn * out_bytes         # outputs
        if with_acc:
            b += n_out * tm * tn * 4                 # f32 accumulators
        return b

    m_cands = sorted({_tile(M, t, m_align) for t in (512, 256, 128, 64, 32, 16, 8)},
                     reverse=True)
    n_cands = sorted({_tile(N_each, t, 128) for t in (512, 256, 128)}, reverse=True)

    # Prefer a full-K contraction (2-D grid, no accumulator, no init/finalize).
    for tm in m_cands:
        for tn in n_cands:
            if usage(tm, tn, K, False) <= budget:
                return tm, tn, K

    # Fall back to K-tiling with accumulators.
    k_cands = sorted({_tile(K, t, 128) for t in (1024, 512, 256, 128)}, reverse=True)
    for tm in m_cands:
        for tn in n_cands:
            for tk in k_cands:
                if usage(tm, tn, tk, True) <= budget:
                    return tm, tn, tk
    return m_cands[-1], n_cands[-1], k_cands[-1]


def _fused_projection(x2d, w_ts, bs, *, out_dtype):
    """Compute [x @ w + b for (w, b) in zip(w_ts, bs)] in ONE pallas_call.
    x2d: (M, K) compute dtype; w_ts[i]: (K, N) compute dtype; bs[i]: (1, N) f32."""
    M, K = x2d.shape
    n = len(w_ts)
    N_each = w_ts[0].shape[1]
    in_bytes = jnp.dtype(x2d.dtype).itemsize
    out_bytes = jnp.dtype(out_dtype).itemsize
    m_align = 16 if in_bytes == 2 else 8
    tm, tn, tk = _choose_linear_tiles(M, K, N_each, n, in_bytes, out_bytes,
                                      _TILE_BUDGET, m_align)
    out_shape = tuple(jax.ShapeDtypeStruct((M, N_each), out_dtype) for _ in range(n))

    if tk == K:
        grid = (M // tm, N_each // tn)
        in_specs = ([pl.BlockSpec((tm, K), lambda i, j: (i, 0))]
                    + [pl.BlockSpec((K, tn), lambda i, j: (0, j))] * n
                    + [pl.BlockSpec((1, tn), lambda i, j: (0, j))] * n)
        out_specs = tuple(pl.BlockSpec((tm, tn), lambda i, j: (i, j))
                          for _ in range(n))
        scratch = []
        kernel = functools.partial(_proj_kernel_fullk, n)
        dims = ("parallel", "parallel")
    else:
        grid = (M // tm, N_each // tn, K // tk)
        in_specs = ([pl.BlockSpec((tm, tk), lambda i, j, k: (i, k))]
                    + [pl.BlockSpec((tk, tn), lambda i, j, k: (k, j))] * n
                    + [pl.BlockSpec((1, tn), lambda i, j, k: (0, j))] * n)
        out_specs = tuple(pl.BlockSpec((tm, tn), lambda i, j, k: (i, j))
                          for _ in range(n))
        scratch = [pltpu.VMEM((tm, tn), jnp.float32) for _ in range(n)]
        kernel = functools.partial(_proj_kernel_tiledk, n)
        dims = ("parallel", "parallel", "arbitrary")

    return pl.pallas_call(
        kernel,
        out_shape=out_shape,
        grid_spec=pltpu.PrefetchScalarGridSpec(
            num_scalar_prefetch=0,
            grid=grid,
            in_specs=in_specs,
            out_specs=out_specs,
            scratch_shapes=scratch,
        ),
        compiler_params=pltpu.CompilerParams(
            dimension_semantics=dims,
            vmem_limit_bytes=_VMEM_LIMIT,
        ),
    )(x2d, *w_ts, *bs)


# ---------------------------------------------------------------------------
# Kernel 2: flash-style multi-head attention (online softmax, f32 accum).
#   Two variants:
#     * per-head grid (d_k % 128 == 0): lane-aligned (tq, d_k) blocks, one
#       head per grid step, extra "parallel" axis for megacore occupancy.
#     * packed (otherwise): all heads in a lane-dense (tq, d_model) block,
#       static unroll over heads.
#   1/temperature is already folded into the Q projection.
# ---------------------------------------------------------------------------
def _mha_flash_kernel_packed(q_ref, k_ref, v_ref, o_ref, m_ref, l_ref, acc_ref,
                             *, h, d_k):
    ki = pl.program_id(2)

    @pl.when(ki == 0)
    def _():
        m_ref[...] = jnp.full_like(m_ref, -1e30)
        l_ref[...] = jnp.zeros_like(l_ref)
        acc_ref[...] = jnp.zeros_like(acc_ref)

    q = q_ref[...]          # (tq, d_model), pre-scaled by 1/temperature
    k = k_ref[...]          # (tk, d_model)
    v = v_ref[...]          # (tk, d_model)

    # TODO(synk): for h >= 8 a lax.fori_loop over heads (or head-group grid
    # axis) would bound live ranges; static unroll is kept because the
    # sub-128-lane dynamic slices it needs are fragile when d_k % 128 != 0.
    for hh in range(h):
        sl = slice(hh * d_k, (hh + 1) * d_k)
        s = lax.dot_general(q[:, sl], k[:, sl],
                            (((1,), (1,)), ((), ())),
                            preferred_element_type=jnp.float32)    # (tq, tk)
        m_prev = m_ref[:, hh:hh + 1]
        m_new = jnp.maximum(m_prev, jnp.max(s, axis=-1, keepdims=True))
        alpha = jnp.exp(m_prev - m_new)
        p = jnp.exp(s - m_new)
        l_ref[:, hh:hh + 1] = alpha * l_ref[:, hh:hh + 1] + jnp.sum(
            p, axis=-1, keepdims=True)
        m_ref[:, hh:hh + 1] = m_new
        acc_ref[:, sl] = alpha * acc_ref[:, sl] + jnp.dot(
            p.astype(v.dtype), v[:, sl], preferred_element_type=jnp.float32)

    @pl.when(ki == pl.num_programs(2) - 1)
    def _():
        for hh in range(h):
            sl = slice(hh * d_k, (hh + 1) * d_k)
            inv_l = pl.reciprocal(l_ref[:, hh:hh + 1], approx=True)
            o_ref[:, sl] = (acc_ref[:, sl] * inv_l).astype(o_ref.dtype)


def _mha_flash_kernel_per_head(q_ref, k_ref, v_ref, o_ref, m_ref, l_ref, acc_ref):
    ki = pl.program_id(3)

    @pl.when(ki == 0)
    def _():
        m_ref[...] = jnp.full_like(m_ref, -1e30)
        l_ref[...] = jnp.zeros_like(l_ref)
        acc_ref[...] = jnp.zeros_like(acc_ref)

    q = q_ref[...]          # (tq, d_k)
    k = k_ref[...]          # (tk, d_k)
    v = v_ref[...]          # (tk, d_k)
    s = lax.dot_general(q, k, (((1,), (1,)), ((), ())),
                        preferred_element_type=jnp.float32)        # (tq, tk)
    m_prev = m_ref[...]
    m_new = jnp.maximum(m_prev, jnp.max(s, axis=-1, keepdims=True))
    alpha = jnp.exp(m_prev - m_new)
    p = jnp.exp(s - m_new)
    l_ref[...] = alpha * l_ref[...] + jnp.sum(p, axis=-1, keepdims=True)
    m_ref[...] = m_new
    acc_ref[...] = alpha * acc_ref[...] + jnp.dot(
        p.astype(v.dtype), v, preferred_element_type=jnp.float32)

    @pl.when(ki == pl.num_programs(3) - 1)
    def _():
        o_ref[...] = (acc_ref[...] *
                      pl.reciprocal(l_ref[...], approx=True)).astype(o_ref.dtype)


def _choose_attn_tiles(Sq, Skv, lane_w, n_stat_cols, in_bytes, out_bytes,
                       budget, align, parallel_units):
    def usage(tq, tk):
        b = 2 * tq * lane_w * in_bytes             # q (double-buffered)
        b += 4 * tk * lane_w * in_bytes            # k + v
        b += 2 * tq * lane_w * out_bytes           # out
        b += tq * lane_w * 4                       # f32 accumulator scratch
        b += 2 * tq * max(n_stat_cols, 128) * 4    # m / l scratch (lane-padded)
        b += 3 * tq * tk * 4                       # transient s / p / alpha
        return b

    targets = (1024, 512, 256, 128, 64, 32, 16, 8)
    q_cands = sorted({_tile(Sq, t, align) for t in targets}, reverse=True)
    k_cands = sorted({_tile(Skv, t, align) for t in targets}, reverse=True)

    chosen = None
    # Prefer the largest tq: K/V HBM re-streaming scales with Skv * (Sq/tq).
    for tq_c in q_cands:
        for tk_c in k_cands:
            if usage(tq_c, tk_c) <= budget:
                chosen = (tq_c, tk_c)
                break
        if chosen is not None:
            break
    if chosen is None:
        chosen = (q_cands[-1], k_cands[-1])   # TODO(synk): pad S + mask instead
    tq, tk = chosen

    # Megacore occupancy (v7x has 2 TCs): keep >= 2 parallel grid steps.
    while parallel_units * (Sq // tq) < 2:
        smaller = [c for c in q_cands if c < tq]
        if not smaller:
            break
        tq = smaller[0]
    return tq, tk


def _attention(q, k, v, *, h, out_dtype, kv_buffers=2):
    B, Sq, d_model = q.shape
    _, Skv, _ = k.shape
    assert d_model % h == 0
    d_k = d_model // h
    in_bytes = jnp.dtype(q.dtype).itemsize
    out_bytes = jnp.dtype(out_dtype).itemsize
    sub_align = 16 if in_bytes == 2 else 8
    per_head = (d_k % 128 == 0)

    lane_w = d_k if per_head else d_model
    n_stat = 1 if per_head else h
    par_units = B * (h if per_head else 1)
    tq, tk = _choose_attn_tiles(Sq, Skv, lane_w, n_stat, in_bytes, out_bytes,
                                _TILE_BUDGET, sub_align, par_units)

    kv_mode = {} if kv_buffers == 2 else {"pipeline_mode": pl.Buffered(kv_buffers)}

    if per_head:
        grid = (B, h, Sq // tq, Skv // tk)
        q_spec = pl.BlockSpec((None, tq, d_k), lambda b, hh, qi, ki: (b, qi, hh))
        k_spec = pl.BlockSpec((None, tk, d_k), lambda b, hh, qi, ki: (b, ki, hh),
                              **kv_mode)
        v_spec = pl.BlockSpec((None, tk, d_k), lambda b, hh, qi, ki: (b, ki, hh),
                              **kv_mode)
        out_spec = pl.BlockSpec((None, tq, d_k), lambda b, hh, qi, ki: (b, qi, hh))
        scratch = [pltpu.VMEM((tq, 1), jnp.float32),
                   pltpu.VMEM((tq, 1), jnp.float32),
                   pltpu.VMEM((tq, d_k), jnp.float32)]
        kernel = _mha_flash_kernel_per_head
        dims = ("parallel", "parallel", "parallel", "arbitrary")
    else:
        grid = (B, Sq // tq, Skv // tk)
        q_spec = pl.BlockSpec((None, tq, d_model), lambda b, qi, ki: (b, qi, 0))
        k_spec = pl.BlockSpec((None, tk, d_model), lambda b, qi, ki: (b, ki, 0),
                              **kv_mode)
        v_spec = pl.BlockSpec((None, tk, d_model), lambda b, qi, ki: (b, ki, 0),
                              **kv_mode)
        out_spec = pl.BlockSpec((None, tq, d_model), lambda b, qi, ki: (b, qi, 0))
        scratch = [pltpu.VMEM((tq, h), jnp.float32),
                   pltpu.VMEM((tq, h), jnp.float32),
                   pltpu.VMEM((tq, d_model), jnp.float32)]
        kernel = functools.partial(_mha_flash_kernel_packed, h=h, d_k=d_k)
        dims = ("parallel", "parallel", "arbitrary")

    return pl.pallas_call(
        kernel,
        out_shape=jax.ShapeDtypeStruct((B, Sq, d_model), out_dtype),
        grid_spec=pltpu.PrefetchScalarGridSpec(
            num_scalar_prefetch=0,
            grid=grid,
            in_specs=[q_spec, k_spec, v_spec],
            out_specs=out_spec,
            scratch_shapes=scratch,
        ),
        compiler_params=pltpu.CompilerParams(
            dimension_semantics=dims,
            vmem_limit_bytes=_VMEM_LIMIT,
        ),
    )(q, k, v)


# ---------------------------------------------------------------------------
# Module wrappers
# ---------------------------------------------------------------------------
def _prepare_weights(params, temperature, cd):
    """Pre-transpose to (K, N), fold 1/temperature into the Q projection, cast
    matmul operands to the compute dtype (biases stay f32)."""
    inv_t = 1.0 / float(temperature)
    wq_t = (params["wq"] * inv_t).T.astype(cd)
    wk_t = params["wk"].T.astype(cd)
    wv_t = params["wv"].T.astype(cd)
    bq = (params["bq"] * inv_t).reshape(1, -1).astype(jnp.float32)
    bk = params["bk"].reshape(1, -1).astype(jnp.float32)
    bv = params["bv"].reshape(1, -1).astype(jnp.float32)
    return (wq_t, bq), (wk_t, bk), (wv_t, bv)


def multi_head_attention(query, key, value, params, *, h, temperature=1.0,
                         compute_dtype=jnp.bfloat16, out_dtype=None,
                         fuse_kv=False, kv_buffers=2):
    """General cross-attention path.  Set fuse_kv=True when key and value are
    the same tensor (encoder memory) to fuse Wk|Wv into one pallas_call."""
    B, Sq, d_model = query.shape
    _, Skv, _ = key.shape
    cd = compute_dtype
    od = out_dtype if out_dtype is not None else query.dtype
    (wq_t, bq), (wk_t, bk), (wv_t, bv) = _prepare_weights(params, temperature, cd)

    def as2d(t, s_len):
        return t.reshape(B * s_len, d_model).astype(cd)

    if (query is key) and (key is value):
        q2, k2, v2 = _fused_projection(as2d(query, Sq), (wq_t, wk_t, wv_t),
                                       (bq, bk, bv), out_dtype=cd)
    else:
        (q2,) = _fused_projection(as2d(query, Sq), (wq_t,), (bq,), out_dtype=cd)
        if fuse_kv or (key is value):
            k2, v2 = _fused_projection(as2d(key, Skv), (wk_t, wv_t), (bk, bv),
                                       out_dtype=cd)
        else:
            (k2,) = _fused_projection(as2d(key, Skv), (wk_t,), (bk,), out_dtype=cd)
            (v2,) = _fused_projection(as2d(value, Skv), (wv_t,), (bv,), out_dtype=cd)

    q = q2.reshape(B, Sq, d_model)
    k = k2.reshape(B, Skv, d_model)
    v = v2.reshape(B, Skv, d_model)
    return _attention(q, k, v, h=h, out_dtype=od, kv_buffers=kv_buffers)


def multi_head_self_attention(x, params, *, h, temperature=1.0,
                              compute_dtype=jnp.bfloat16, out_dtype=None,
                              kv_buffers=2):
    """Self-attention path: one fused QKV projection with three outputs (x is
    read from HBM once; no post-kernel split / reshape copies)."""
    B, S, d_model = x.shape
    cd = compute_dtype
    od = out_dtype if out_dtype is not None else x.dtype
    (wq_t, bq), (wk_t, bk), (wv_t, bv) = _prepare_weights(params, temperature, cd)
    x2d = x.reshape(B * S, d_model).astype(cd)
    q2, k2, v2 = _fused_projection(x2d, (wq_t, wk_t, wv_t), (bq, bk, bv),
                                   out_dtype=cd)
    q = q2.reshape(B, S, d_model)
    k = k2.reshape(B, S, d_model)
    v = v2.reshape(B, S, d_model)
    return _attention(q, k, v, h=h, out_dtype=od, kv_buffers=kv_buffers)


def init_params(key, d_model):
    ks = jax.random.split(key, 6)
    scale = 1.0 / jnp.sqrt(d_model)
    return {
        "wq": jax.random.uniform(ks[0], (d_model, d_model), jnp.float32, -scale, scale),
        "bq": jax.random.uniform(ks[1], (d_model,), jnp.float32, -scale, scale),
        "wk": jax.random.uniform(ks[2], (d_model, d_model), jnp.float32, -scale, scale),
        "bk": jax.random.uniform(ks[3], (d_model,), jnp.float32, -scale, scale),
        "wv": jax.random.uniform(ks[4], (d_model, d_model), jnp.float32, -scale, scale),
        "bv": jax.random.uniform(ks[5], (d_model,), jnp.float32, -scale, scale),
    }


# ---------------------------------------------------------------------------
# Pure-JAX reference (no Pallas).  compute_dtype=bf16 mirrors the kernel's
# mixed precision (tight check); compute_dtype=f32 is the torch-exact math.
# ---------------------------------------------------------------------------
def mha_reference(query, key, value, params, *, h, temperature, compute_dtype):
    B, S, d_model = query.shape
    d_k = d_model // h
    cd = compute_dtype
    inv_t = 1.0 / float(temperature)

    def proj(x, w, b, scale):
        w_eff = (w * scale).astype(cd)
        b_eff = (b * scale).astype(jnp.float32)
        y = jnp.dot(x.reshape(B * S, d_model).astype(cd), w_eff.T,
                    preferred_element_type=jnp.float32) + b_eff
        return y.astype(cd).reshape(B, S, h, d_k).transpose(0, 2, 1, 3)

    q = proj(query, params["wq"], params["bq"], inv_t)
    k = proj(key, params["wk"], params["bk"], 1.0)
    v = proj(value, params["wv"], params["bv"], 1.0)
    s = jnp.einsum("bhqd,bhkd->bhqk", q, k, preferred_element_type=jnp.float32)
    m = jnp.max(s, axis=-1, keepdims=True)
    p = jnp.exp(s - m)
    l = jnp.sum(p, axis=-1, keepdims=True)
    o = jnp.einsum("bhqk,bhkd->bhqd", p.astype(cd), v,
                   preferred_element_type=jnp.float32) / l
    return o.transpose(0, 2, 1, 3).reshape(B, S, d_model)


if __name__ == "__main__":
    root = jax.random.PRNGKey(0)
    kp, kq, kk, kv, kp2, kx2 = jax.random.split(root, 6)

    # --- Case 1/2/3: small d_model, d_k = 8 (packed all-heads kernel) -------
    B, S, d_model, h = 2, 8, 32, 4
    temperature = 1.5
    params = init_params(kp, d_model)
    query = jax.random.normal(kq, (B, S, d_model), jnp.float32)
    key_x = jax.random.normal(kk, (B, S, d_model), jnp.float32)
    value = jax.random.normal(kv, (B, S, d_model), jnp.float32)

    mha = jax.jit(functools.partial(
        multi_head_attention, h=h, temperature=temperature))
    mha_kv = jax.jit(functools.partial(
        multi_head_attention, h=h, temperature=temperature, fuse_kv=True))
    self_mha = jax.jit(functools.partial(
        multi_head_self_attention, h=h, temperature=temperature))

    # General cross-attention (three separate projections).
    out = jax.block_until_ready(mha(query, key_x, value, params))
    assert out.shape == (B, S, d_model)
    ref_mirror = mha_reference(query, key_x, value, params, h=h,
                               temperature=temperature, compute_dtype=jnp.bfloat16)
    ref_exact = mha_reference(query, key_x, value, params, h=h,
                              temperature=temperature, compute_dtype=jnp.float32)
    assert jnp.allclose(out, ref_mirror, atol=1e-2, rtol=1e-2)
    assert jnp.allclose(out, ref_exact, atol=8e-2, rtol=5e-2)

    # Shared key/value (fused KV projection).
    out_kv = jax.block_until_ready(mha_kv(query, key_x, key_x, params))
    ref_kv = mha_reference(query, key_x, key_x, params, h=h,
                           temperature=temperature, compute_dtype=jnp.bfloat16)
    assert jnp.allclose(out_kv, ref_kv, atol=1e-2, rtol=1e-2)

    # Self-attention (fused QKV projection, single multi-output pallas_call).
    out_self = jax.block_until_ready(self_mha(query, params))
    ref_self = mha_reference(query, query, query, params, h=h,
                             temperature=temperature, compute_dtype=jnp.bfloat16)
    assert out_self.shape == (B, S, d_model)
    assert jnp.allclose(out_self, ref_self, atol=1e-2, rtol=1e-2)

    # --- Case 4: d_k = 128 -> lane-aligned per-head grid attention kernel ---
    B2, S2, d_model2, h2 = 1, 16, 256, 2
    params2 = init_params(kp2, d_model2)
    x2 = jax.random.normal(kx2, (B2, S2, d_model2), jnp.float32)
    self_mha2 = jax.jit(functools.partial(
        multi_head_self_attention, h=h2, temperature=1.0))
    out2 = jax.block_until_ready(self_mha2(x2, params2))
    ref2 = mha_reference(x2, x2, x2, params2, h=h2, temperature=1.0,
                         compute_dtype=jnp.bfloat16)
    assert out2.shape == (B2, S2, d_model2)
    assert jnp.allclose(out2, ref2, atol=2e-2, rtol=2e-2)

    print("KERNEL_OK")
</pallas_src>

<mosaic_0001>
module attributes {stable_mosaic.version = 11 : i64} {
  func.func @_proj_kernel_fullk(%arg0: i32, %arg1: i32, %arg2: memref<16x32xbf16, #tpu.memory_space<vmem>>, %arg3: memref<32x32xbf16, #tpu.memory_space<vmem>>, %arg4: memref<1x32xf32, #tpu.memory_space<vmem>>, %arg5: memref<16x32xbf16, #tpu.memory_space<vmem>>) attributes {dimension_semantics = [#tpu.dimension_semantics<parallel>, #tpu.dimension_semantics<parallel>], iteration_bounds = array<i64: 1, 1>, scalar_prefetch = 0 : i64, scratch_operands = 0 : i64, tpu.core_type = #tpu.core_type<tc>, window_params = [{transform_indices = @transform_0, window_bounds = array<i64: 16, 32>}, {transform_indices = @transform_1, window_bounds = array<i64: 32, 32>}, {transform_indices = @transform_2, window_bounds = array<i64: 1, 32>}, {transform_indices = @transform_3, window_bounds = array<i64: 16, 32>}]} {
    %c0 = arith.constant 0 : index
    %c0_0 = arith.constant 0 : index
    %0 = vector.load %arg2[%c0, %c0_0] : memref<16x32xbf16, #tpu.memory_space<vmem>>, vector<16x32xbf16>
    %c0_1 = arith.constant 0 : index
    %c0_2 = arith.constant 0 : index
    %1 = vector.load %arg3[%c0_1, %c0_2] : memref<32x32xbf16, #tpu.memory_space<vmem>>, vector<32x32xbf16>
    %cst = arith.constant dense<0.000000e+00> : vector<16x32xf32>
    %2 = tpu.matmul %0, %1, %cst {dimension_numbers = #tpu.dot_dimension_numbers<[1], [0], [0], [1], [0, 0, 1, 1], [], []>} : vector<16x32xbf16>, vector<32x32xbf16>, vector<16x32xf32> -> vector<16x32xf32>
    %c0_3 = arith.constant 0 : index
    %c0_4 = arith.constant 0 : index
    %3 = vector.load %arg4[%c0_3, %c0_4] : memref<1x32xf32, #tpu.memory_space<vmem>>, vector<1x32xf32>
    %4 = vector.broadcast %3 : vector<1x32xf32> to vector<16x32xf32>
    %5 = arith.addf %2, %4 : vector<16x32xf32>
    %6 = arith.truncf %5 : vector<16x32xf32> to vector<16x32xbf16>
    %c0_5 = arith.constant 0 : index
    %c0_6 = arith.constant 0 : index
    %7 = vector.load %arg5[%c0_5, %c0_6] : memref<16x32xbf16, #tpu.memory_space<vmem>>, vector<16x32xbf16>
    tpu.vector_store %arg5[%c0_5, %c0_6], %6 {strides = array<i32>} : memref<16x32xbf16, #tpu.memory_space<vmem>>, vector<16x32xbf16>,
    return
  }
  func.func @transform_0(%arg0: i32, %arg1: i32) -> (i32, i32) {
    %c0_i32 = arith.constant 0 : i32
    %c0_i32_0 = arith.constant 0 : i32
    return %arg0, %c0_i32 : i32, i32
  }
  func.func @transform_1(%arg0: i32, %arg1: i32) -> (i32, i32) {
    %c0_i32 = arith.constant 0 : i32
    %c0_i32_0 = arith.constant 0 : i32
    return %c0_i32, %arg1 : i32, i32
  }
  func.func @transform_2(%arg0: i32, %arg1: i32) -> (i32, i32) {
    %c0_i32 = arith.constant 0 : i32
    %c0_i32_0 = arith.constant 0 : i32
    return %c0_i32, %arg1 : i32, i32
  }
  func.func @transform_3(%arg0: i32, %arg1: i32) -> (i32, i32) {
    %c0_i32 = arith.constant 0 : i32
    return %arg0, %arg1 : i32, i32
  }
}

module attributes {stable_mosaic.version = 11 : i64} {
  func.func @_mha_flash_kernel_packed(%arg0: i32, %arg1: i32, %arg2: i32, %arg3: memref<1x8x32xbf16, #tpu.memory_space<vmem>>, %arg4: memref<1x8x32xbf16, #tpu.memory_space<vmem>>, %arg5: memref<1x8x32xbf16, #tpu.memory_space<vmem>>, %arg6: memref<1x8x32xf32, #tpu.memory_space<vmem>>, %arg7: memref<8x4xf32, #tpu.memory_space<vmem>>, %arg8: memref<8x4xf32, #tpu.memory_space<vmem>>, %arg9: memref<8x32xf32, #tpu.memory_space<vmem>>) attributes {dimension_semantics = [#tpu.dimension_semantics<parallel>, #tpu.dimension_semantics<parallel>, #tpu.dimension_semantics<arbitrary>], iteration_bounds = array<i64: 2, 1, 1>, scalar_prefetch = 0 : i64, scratch_operands = 3 : i64, tpu.core_type = #tpu.core_type<tc>, window_params = [{transform_indices = @transform_0, window_bounds = array<i64: 1, 8, 32>}, {transform_indices = @transform_1, window_bounds = array<i64: 1, 8, 32>}, {transform_indices = @transform_2, window_bounds = array<i64: 1, 8, 32>}, {transform_indices = @transform_3, window_bounds = array<i64: 1, 8, 32>}]} {
    %c0_i32 = arith.constant 0 : i32
    %0 = arith.cmpi eq, %arg2, %c0_i32 : i32
    %1 = arith.extui %0 : i1 to i32
    %c0_i32_0 = arith.constant 0 : i32
    %2 = arith.cmpi ne, %1, %c0_i32_0 : i32
    scf.if %2 {
      %cst_68 = arith.constant -1.000000e+30 : f32
      %120 = vector.broadcast %cst_68 : f32 to vector<8x4xf32>
      %c0_69 = arith.constant 0 : index
      %c0_70 = arith.constant 0 : index
      %121 = vector.load %arg7[%c0_69, %c0_70] : memref<8x4xf32, #tpu.memory_space<vmem>>, vector<8x4xf32>
      tpu.vector_store %arg7[%c0_69, %c0_70], %120 {strides = array<i32>} : memref<8x4xf32, #tpu.memory_space<vmem>>, vector<8x4xf32>,
      %cst_71 = arith.constant 0.000000e+00 : f32
      %122 = vector.broadcast %cst_71 : f32 to vector<8x4xf32>
      %c0_72 = arith.constant 0 : index
      %c0_73 = arith.constant 0 : index
      %123 = vector.load %arg8[%c0_72, %c0_73] : memref<8x4xf32, #tpu.memory_space<vmem>>, vector<8x4xf32>
      tpu.vector_store %arg8[%c0_72, %c0_73], %122 {strides = array<i32>} : memref<8x4xf32, #tpu.memory_space<vmem>>, vector<8x4xf32>,
      %cst_74 = arith.constant 0.000000e+00 : f32
      %124 = vector.broadcast %cst_74 : f32 to vector<8x32xf32>
      %c0_75 = arith.constant 0 : index
      %c0_76 = arith.constant 0 : index
      %125 = vector.load %arg9[%c0_75, %c0_76] : memref<8x32xf32, #tpu.memory_space<vmem>>, vector<8x32xf32>
      tpu.vector_store %arg9[%c0_75, %c0_76], %124 {strides = array<i32>} : memref<8x32xf32, #tpu.memory_space<vmem>>, vector<8x32xf32>,
    } else {
    }
    %c0 = arith.constant 0 : index
    %c0_1 = arith.constant 0 : index
    %c0_2 = arith.constant 0 : index
    %3 = vector.load %arg3[%c0, %c0_1, %c0_2] : memref<1x8x32xbf16, #tpu.memory_space<vmem>>, vector<1x8x32xbf16>
    %4 = vector.shape_cast %3 : vector<1x8x32xbf16> to vector<8x32xbf16>
    %c0_3 = arith.constant 0 : index
    %c0_4 = arith.constant 0 : index
    %c0_5 = arith.constant 0 : index
    %5 = vector.load %arg4[%c0_3, %c0_4, %c0_5] : memref<1x8x32xbf16, #tpu.memory_space<vmem>>, vector<1x8x32xbf16>
    %6 = vector.shape_cast %5 : vector<1x8x32xbf16> to vector<8x32xbf16>
    %c0_6 = arith.constant 0 : index
    %c0_7 = arith.constant 0 : index
    %c0_8 = arith.constant 0 : index
    %7 = vector.load %arg5[%c0_6, %c0_7, %c0_8] : memref<1x8x32xbf16, #tpu.memory_space<vmem>>, vector<1x8x32xbf16>
    %8 = vector.shape_cast %7 : vector<1x8x32xbf16> to vector<8x32xbf16>
    %9 = vector.extract_strided_slice %4 {offsets = [0, 0], sizes = [8, 8], strides = [1, 1]} : vector<8x32xbf16> to vector<8x8xbf16>
    %10 = vector.extract_strided_slice %6 {offsets = [0, 0], sizes = [8, 8], strides = [1, 1]} : vector<8x32xbf16> to vector<8x8xbf16>
    %cst = arith.constant dense<0.000000e+00> : vector<8x8xf32>
    %11 = tpu.matmul %9, %10, %cst {dimension_numbers = #tpu.dot_dimension_numbers<[1], [1], [0], [0], [0, 0, 1, 0], [], []>} : vector<8x8xbf16>, vector<8x8xbf16>, vector<8x8xf32> -> vector<8x8xf32>
    %c0_9 = arith.constant 0 : index
    %c0_10 = arith.constant 0 : index
    %12 = vector.load %arg7[%c0_9, %c0_10] : memref<8x4xf32, #tpu.memory_space<vmem>>, vector<8x1xf32>
    %cst_11 = arith.constant dense<0xFF800000> : vector<8xf32>
    %13 = vector.multi_reduction <maximumf>, %11, %cst_11 [1] : vector<8x8xf32> to vector<8xf32>
    %14 = vector.shape_cast %13 : vector<8xf32> to vector<8x1xf32>
    %15 = arith.maximumf %12, %14 : vector<8x1xf32>
    %16 = arith.subf %12, %15 : vector<8x1xf32>
    %17 = math.exp %16 : vector<8x1xf32>
    %18 = vector.broadcast %15 : vector<8x1xf32> to vector<8x8xf32>
    %19 = arith.subf %11, %18 : vector<8x8xf32>
    %20 = math.exp %19 : vector<8x8xf32>
    %c0_12 = arith.constant 0 : index
    %c0_13 = arith.constant 0 : index
    %21 = vector.load %arg8[%c0_12, %c0_13] : memref<8x4xf32, #tpu.memory_space<vmem>>, vector<8x1xf32>
    %22 = arith.mulf %17, %21 : vector<8x1xf32>
    %cst_14 = arith.constant dense<0.000000e+00> : vector<8xf32>
    %23 = vector.multi_reduction <add>, %20, %cst_14 [1] : vector<8x8xf32> to vector<8xf32>
    %24 = vector.shape_cast %23 : vector<8xf32> to vector<8x1xf32>
    %25 = arith.addf %22, %24 : vector<8x1xf32>
    %c0_15 = arith.constant 0 : index
    %c0_16 = arith.constant 0 : index
    %26 = vector.load %arg8[%c0_15, %c0_16] : memref<8x4xf32, #tpu.memory_space<vmem>>, vector<8x1xf32>
    tpu.vector_store %arg8[%c0_15, %c0_16], %25 {strides = array<i32>} : memref<8x4xf32, #tpu.memory_space<vmem>>, vector<8x1xf32>,
    %c0_17 = arith.constant 0 : index
    %c0_18 = arith.constant 0 : index
    %27 = vector.load %arg7[%c0_17, %c0_18] : memref<8x4xf32, #tpu.memory_space<vmem>>, vector<8x1xf32>
    tpu.vector_store %arg7[%c0_17, %c0_18], %15 {strides = array<i32>} : memref<8x4xf32, #tpu.memory_space<vmem>>, vector<8x1xf32>,
    %c0_19 = arith.constant 0 : index
    %c0_20 = arith.constant 0 : index
    %28 = vector.load %arg9[%c0_19, %c0_20] : memref<8x32xf32, #tpu.memory_space<vmem>>, vector<8x8xf32>
    %29 = vector.broadcast %17 : vector<8x1xf32> to vector<8x8xf32>
    %30 = arith.mulf %29, %28 : vector<8x8xf32>
    %31 = arith.truncf %20 : vector<8x8xf32> to vector<8x8xbf16>
    %32 = vector.extract_strided_slice %8 {offsets = [0, 0], sizes = [8, 8], strides = [1, 1]} : vector<8x32xbf16> to vector<8x8xbf16>
    %cst_21 = arith.constant dense<0.000000e+00> : vector<8x8xf32>
    %33 = tpu.matmul %31, %32, %cst_21 {dimension_numbers = #tpu.dot_dimension_numbers<[1], [0], [0], [1], [0, 0, 1, 1], [], []>} : vector<8x8xbf16>, vector<8x8xbf16>, vector<8x8xf32> -> vector<8x8xf32>
    %34 = arith.addf %30, %33 : vector<8x8xf32>
    %c0_22 = arith.constant 0 : index
    %c0_23 = arith.constant 0 : index
    %35 = vector.load %arg9[%c0_22, %c0_23] : memref<8x32xf32, #tpu.memory_space<vmem>>, vector<8x8xf32>
    tpu.vector_store %arg9[%c0_22, %c0_23], %34 {strides = array<i32>} : memref<8x32xf32, #tpu.memory_space<vmem>>, vector<8x8xf32>,
    %36 = vector.extract_strided_slice %4 {offsets = [0, 8], sizes = [8, 8], strides = [1, 1]} : vector<8x32xbf16> to vector<8x8xbf16>
    %37 = vector.extract_strided_slice %6 {offsets = [0, 8], sizes = [8, 8], strides = [1, 1]} : vector<8x32xbf16> to vector<8x8xbf16>
    %cst_24 = arith.constant dense<0.000000e+00> : vector<8x8xf32>
    %38 = tpu.matmul %36, %37, %cst_24 {dimension_numbers = #tpu.dot_dimension_numbers<[1], [1], [0], [0], [0, 0, 1, 0], [], []>} : vector<8x8xbf16>, vector<8x8xbf16>, vector<8x8xf32> -> vector<8x8xf32>
    %c0_25 = arith.constant 0 : index
    %c1 = arith.constant 1 : index
    %39 = vector.load %arg7[%c0_25, %c1] : memref<8x4xf32, #tpu.memory_space<vmem>>, vector<8x1xf32>
    %cst_26 = arith.constant dense<0xFF800000> : vector<8xf32>
    %40 = vector.multi_reduction <maximumf>, %38, %cst_26 [1] : vector<8x8xf32> to vector<8xf32>
    %41 = vector.shape_cast %40 : vector<8xf32> to vector<8x1xf32>
    %42 = arith.maximumf %39, %41 : vector<8x1xf32>
    %43 = arith.subf %39, %42 : vector<8x1xf32>
    %44 = math.exp %43 : vector<8x1xf32>
    %45 = vector.broadcast %42 : vector<8x1xf32> to vector<8x8xf32>
    %46 = arith.subf %38, %45 : vector<8x8xf32>
    %47 = math.exp %46 : vector<8x8xf32>
    %c0_27 = arith.constant 0 : index
    %c1_28 = arith.constant 1 : index
    %48 = vector.load %arg8[%c0_27, %c1_28] : memref<8x4xf32, #tpu.memory_space<vmem>>, vector<8x1xf32>
    %49 = arith.mulf %44, %48 : vector<8x1xf32>
    %cst_29 = arith.constant dense<0.000000e+00> : vector<8xf32>
    %50 = vector.multi_reduction <add>, %47, %cst_29 [1] : vector<8x8xf32> to vector<8xf32>
    %51 = vector.shape_cast %50 : vector<8xf32> to vector<8x1xf32>
    %52 = arith.addf %49, %51 : vector<8x1xf32>
    %c0_30 = arith.constant 0 : index
    %c1_31 = arith.constant 1 : index
    %53 = vector.load %arg8[%c0_30, %c1_31] : memref<8x4xf32, #tpu.memory_space<vmem>>, vector<8x1xf32>
    tpu.vector_store %arg8[%c0_30, %c1_31], %52 {strides = array<i32>} : memref<8x4xf32, #tpu.memory_space<vmem>>, vector<8x1xf32>,
    %c0_32 = arith.constant 0 : index
    %c1_33 = arith.constant 1 : index
    %54 = vector.load %arg7[%c0_32, %c1_33] : memref<8x4xf32, #tpu.memory_space<vmem>>, vector<8x1xf32>
    tpu.vector_store %arg7[%c0_32, %c1_33], %42 {strides = array<i32>} : memref<8x4xf32, #tpu.memory_space<vmem>>, vector<8x1xf32>,
    %c0_34 = arith.constant 0 : index
    %c8 = arith.constant 8 : index
    %55 = vector.load %arg9[%c0_34, %c8] : memref<8x32xf32, #tpu.memory_space<vmem>>, vector<8x8xf32>
    %56 = vector.broadcast %44 : vector<8x1xf32> to vector<8x8xf32>
    %57 = arith.mulf %56, %55 : vector<8x8xf32>
    %58 = arith.truncf %47 : vector<8x8xf32> to vector<8x8xbf16>
    %59 = vector.extract_strided_slice %8 {offsets = [0, 8], sizes = [8, 8], strides = [1, 1]} : vector<8x32xbf16> to vector<8x8xbf16>
    %cst_35 = arith.constant dense<0.000000e+00> : vector<8x8xf32>
    %60 = tpu.matmul %58, %59, %cst_35 {dimension_numbers = #tpu.dot_dimension_numbers<[1], [0], [0], [1], [0, 0, 1, 1], [], []>} : vector<8x8xbf16>, vector<8x8xbf16>, vector<8x8xf32> -> vector<8x8xf32>
    %61 = arith.addf %57, %60 : vector<8x8xf32>
    %c0_36 = arith.constant 0 : index
    %c8_37 = arith.constant 8 : index
    %62 = vector.load %arg9[%c0_36, %c8_37] : memref<8x32xf32, #tpu.memory_space<vmem>>, vector<8x8xf32>
    tpu.vector_store %arg9[%c0_36, %c8_37], %61 {strides = array<i32>} : memref<8x32xf32, #tpu.memory_space<vmem>>, vector<8x8xf32>,
    %63 = vector.extract_strided_slice %4 {offsets = [0, 16], sizes = [8, 8], strides = [1, 1]} : vector<8x32xbf16> to vector<8x8xbf16>
    %64 = vector.extract_strided_slice %6 {offsets = [0, 16], sizes = [8, 8], strides = [1, 1]} : vector<8x32xbf16> to vector<8x8xbf16>
    %cst_38 = arith.constant dense<0.000000e+00> : vector<8x8xf32>
    %65 = tpu.matmul %63, %64, %cst_38 {dimension_numbers = #tpu.dot_dimension_numbers<[1], [1], [0], [0], [0, 0, 1, 0], [], []>} : vector<8x8xbf16>, vector<8x8xbf16>, vector<8x8xf32> -> vector<8x8xf32>
    %c0_39 = arith.constant 0 : index
    %c2 = arith.constant 2 : index
    %66 = vector.load %arg7[%c0_39, %c2] : memref<8x4xf32, #tpu.memory_space<vmem>>, vector<8x1xf32>
    %cst_40 = arith.constant dense<0xFF800000> : vector<8xf32>
    %67 = vector.multi_reduction <maximumf>, %65, %cst_40 [1] : vector<8x8xf32> to vector<8xf32>
    %68 = vector.shape_cast %67 : vector<8xf32> to vector<8x1xf32>
    %69 = arith.maximumf %66, %68 : vector<8x1xf32>
    %70 = arith.subf %66, %69 : vector<8x1xf32>
    %71 = math.exp %70 : vector<8x1xf32>
    %72 = vector.broadcast %69 : vector<8x1xf32> to vector<8x8xf32>
    %73 = arith.subf %65, %72 : vector<8x8xf32>
    %74 = math.exp %73 : vector<8x8xf32>
    %c0_41 = arith.constant 0 : index
    %c2_42 = arith.constant 2 : index
    %75 = vector.load %arg8[%c0_41, %c2_42] : memref<8x4xf32, #tpu.memory_space<vmem>>, vector<8x1xf32>
    %76 = arith.mulf %71, %75 : vector<8x1xf32>
    %cst_43 = arith.constant dense<0.000000e+00> : vector<8xf32>
    %77 = vector.multi_reduction <add>, %74, %cst_43 [1] : vector<8x8xf32> to vector<8xf32>
    %78 = vector.shape_cast %77 : vector<8xf32> to vector<8x1xf32>
    %79 = arith.addf %76, %78 : vector<8x1xf32>
    %c0_44 = arith.constant 0 : index
    %c2_45 = arith.constant 2 : index
    %80 = vector.load %arg8[%c0_44, %c2_45] : memref<8x4xf32, #tpu.memory_space<vmem>>, vector<8x1xf32>
    tpu.vector_store %arg8[%c0_44, %c2_45], %79 {strides = array<i32>} : memref<8x4xf32, #tpu.memory_space<vmem>>, vector<8x1xf32>,
    %c0_46 = arith.constant 0 : index
    %c2_47 = arith.constant 2 : index
    %81 = vector.load %arg7[%c0_46, %c2_47] : memref<8x4xf32, #tpu.memory_space<vmem>>, vector<8x1xf32>
    tpu.vector_store %arg7[%c0_46, %c2_47], %69 {strides = array<i32>} : memref<8x4xf32, #tpu.memory_space<vmem>>, vector<8x1xf32>,
    %c0_48 = arith.constant 0 : index
    %c16 = arith.constant 16 : index
    %82 = vector.load %arg9[%c0_48, %c16] : memref<8x32xf32, #tpu.memory_space<vmem>>, vector<8x8xf32>
    %83 = vector.broadcast %71 : vector<8x1xf32> to vector<8x8xf32>
    %84 = arith.mulf %83, %82 : vector<8x8xf32>
    %85 = arith.truncf %74 : vector<8x8xf32> to vector<8x8xbf16>
    %86 = vector.extract_strided_slice %8 {offsets = [0, 16], sizes = [8, 8], strides = [1, 1]} : vector<8x32xbf16> to vector<8x8xbf16>
    %cst_49 = arith.constant dense<0.000000e+00> : vector<8x8xf32>
    %87 = tpu.matmul %85, %86, %cst_49 {dimension_numbers = #tpu.dot_dimension_numbers<[1], [0], [0], [1], [0, 0, 1, 1], [], []>} : vector<8x8xbf16>, vector<8x8xbf16>, vector<8x8xf32> -> vector<8x8xf32>
    %88 = arith.addf %84, %87 : vector<8x8xf32>
    %c0_50 = arith.constant 0 : index
    %c16_51 = arith.constant 16 : index
    %89 = vector.load %arg9[%c0_50, %c16_51] : memref<8x32xf32, #tpu.memory_space<vmem>>, vector<8x8xf32>
    tpu.vector_store %arg9[%c0_50, %c16_51], %88 {strides = array<i32>} : memref<8x32xf32, #tpu.memory_space<vmem>>, vector<8x8xf32>,
    %90 = vector.extract_strided_slice %4 {offsets = [0, 24], sizes = [8, 8], strides = [1, 1]} : vector<8x32xbf16> to vector<8x8xbf16>
    %91 = vector.extract_strided_slice %6 {offsets = [0, 24], sizes = [8, 8], strides = [1, 1]} : vector<8x32xbf16> to vector<8x8xbf16>
    %cst_52 = arith.constant dense<0.000000e+00> : vector<8x8xf32>
    %92 = tpu.matmul %90, %91, %cst_52 {dimension_numbers = #tpu.dot_dimension_numbers<[1], [1], [0], [0], [0, 0, 1, 0], [], []>} : vector<8x8xbf16>, vector<8x8xbf16>, vector<8x8xf32> -> vector<8x8xf32>
    %c0_53 = arith.constant 0 : index
    %c3 = arith.constant 3 : index
    %93 = vector.load %arg7[%c0_53, %c3] : memref<8x4xf32, #tpu.memory_space<vmem>>, vector<8x1xf32>
    %cst_54 = arith.constant dense<0xFF800000> : vector<8xf32>
    %94 = vector.multi_reduction <maximumf>, %92, %cst_54 [1] : vector<8x8xf32> to vector<8xf32>
    %95 = vector.shape_cast %94 : vector<8xf32> to vector<8x1xf32>
    %96 = arith.maximumf %93, %95 : vector<8x1xf32>
    %97 = arith.subf %93, %96 : vector<8x1xf32>
    %98 = math.exp %97 : vector<8x1xf32>
    %99 = vector.broadcast %96 : vector<8x1xf32> to vector<8x8xf32>
    %100 = arith.subf %92, %99 : vector<8x8xf32>
    %101 = math.exp %100 : vector<8x8xf32>
    %c0_55 = arith.constant 0 : index
    %c3_56 = arith.constant 3 : index
    %102 = vector.load %arg8[%c0_55, %c3_56] : memref<8x4xf32, #tpu.memory_space<vmem>>, vector<8x1xf32>
    %103 = arith.mulf %98, %102 : vector<8x1xf32>
    %cst_57 = arith.constant dense<0.000000e+00> : vector<8xf32>
    %104 = vector.multi_reduction <add>, %101, %cst_57 [1] : vector<8x8xf32> to vector<8xf32>
    %105 = vector.shape_cast %104 : vector<8xf32> to vector<8x1xf32>
    %106 = arith.addf %103, %105 : vector<8x1xf32>
    %c0_58 = arith.constant 0 : index
    %c3_59 = arith.constant 3 : index
    %107 = vector.load %arg8[%c0_58, %c3_59] : memref<8x4xf32, #tpu.memory_space<vmem>>, vector<8x1xf32>
    tpu.vector_store %arg8[%c0_58, %c3_59], %106 {strides = array<i32>} : memref<8x4xf32, #tpu.memory_space<vmem>>, vector<8x1xf32>,
    %c0_60 = arith.constant 0 : index
    %c3_61 = arith.constant 3 : index
    %108 = vector.load %arg7[%c0_60, %c3_61] : memref<8x4xf32, #tpu.memory_space<vmem>>, vector<8x1xf32>
    tpu.vector_store %arg7[%c0_60, %c3_61], %96 {strides = array<i32>} : memref<8x4xf32, #tpu.memory_space<vmem>>, vector<8x1xf32>,
    %c0_62 = arith.constant 0 : index
    %c24 = arith.constant 24 : index
    %109 = vector.load %arg9[%c0_62, %c24] : memref<8x32xf32, #tpu.memory_space<vmem>>, vector<8x8xf32>
    %110 = vector.broadcast %98 : vector<8x1xf32> to vector<8x8xf32>
    %111 = arith.mulf %110, %109 : vector<8x8xf32>
    %112 = arith.truncf %101 : vector<8x8xf32> to vector<8x8xbf16>
    %113 = vector.extract_strided_slice %8 {offsets = [0, 24], sizes = [8, 8], strides = [1, 1]} : vector<8x32xbf16> to vector<8x8xbf16>
    %cst_63 = arith.constant dense<0.000000e+00> : vector<8x8xf32>
    %114 = tpu.matmul %112, %113, %cst_63 {dimension_numbers = #tpu.dot_dimension_numbers<[1], [0], [0], [1], [0, 0, 1, 1], [], []>} : vector<8x8xbf16>, vector<8x8xbf16>, vector<8x8xf32> -> vector<8x8xf32>
    %115 = arith.addf %111, %114 : vector<8x8xf32>
    %c0_64 = arith.constant 0 : index
    %c24_65 = arith.constant 24 : index
    %116 = vector.load %arg9[%c0_64, %c24_65] : memref<8x32xf32, #tpu.memory_space<vmem>>, vector<8x8xf32>
    tpu.vector_store %arg9[%c0_64, %c24_65], %115 {strides = array<i32>} : memref<8x32xf32, #tpu.memory_space<vmem>>, vector<8x8xf32>,
    %c0_i32_66 = arith.constant 0 : i32
    %117 = arith.cmpi eq, %arg2, %c0_i32_66 : i32
    %118 = arith.extui %117 : i1 to i32
    %c0_i32_67 = arith.constant 0 : i32
    %119 = arith.cmpi ne, %118, %c0_i32_67 : i32
    scf.if %119 {
      %c0_68 = arith.constant 0 : index
      %c0_69 = arith.constant 0 : index
      %120 = vector.load %arg8[%c0_68, %c0_69] : memref<8x4xf32, #tpu.memory_space<vmem>>, vector<8x1xf32>
      %121 = tpu.reciprocal %120 {approx = true} : vector<8x1xf32> -> vector<8x1xf32>
      %c0_70 = arith.constant 0 : index
      %c0_71 = arith.constant 0 : index
      %122 = vector.load %arg9[%c0_70, %c0_71] : memref<8x32xf32, #tpu.memory_space<vmem>>, vector<8x8xf32>
      %123 = vector.broadcast %121 : vector<8x1xf32> to vector<8x8xf32>
      %124 = arith.mulf %122, %123 : vector<8x8xf32>
      %c0_72 = arith.constant 0 : index
      %c0_73 = arith.constant 0 : index
      %c0_74 = arith.constant 0 : index
      %125 = vector.load %arg6[%c0_72, %c0_73, %c0_74] : memref<1x8x32xf32, #tpu.memory_space<vmem>>, vector<1x8x8xf32>
      %126 = vector.shape_cast %125 : vector<1x8x8xf32> to vector<8x8xf32>
      %127 = vector.shape_cast %124 : vector<8x8xf32> to vector<1x8x8xf32>
      tpu.vector_store %arg6[%c0_72, %c0_73, %c0_74], %127 {strides = array<i32>} : memref<1x8x32xf32, #tpu.memory_space<vmem>>, vector<1x8x8xf32>,
      %c0_75 = arith.constant 0 : index
      %c1_76 = arith.constant 1 : index
      %128 = vector.load %arg8[%c0_75, %c1_76] : memref<8x4xf32, #tpu.memory_space<vmem>>, vector<8x1xf32>
      %129 = tpu.reciprocal %128 {approx = true} : vector<8x1xf32> -> vector<8x1xf32>
      %c0_77 = arith.constant 0 : index
      %c8_78 = arith.constant 8 : index
      %130 = vector.load %arg9[%c0_77, %c8_78] : memref<8x32xf32, #tpu.memory_space<vmem>>, vector<8x8xf32>
      %131 = vector.broadcast %129 : vector<8x1xf32> to vector<8x8xf32>
      %132 = arith.mulf %130, %131 : vector<8x8xf32>
      %c0_79 = arith.constant 0 : index
      %c0_80 = arith.constant 0 : index
      %c8_81 = arith.constant 8 : index
      %133 = vector.load %arg6[%c0_79, %c0_80, %c8_81] : memref<1x8x32xf32, #tpu.memory_space<vmem>>, vector<1x8x8xf32>
      %134 = vector.shape_cast %133 : vector<1x8x8xf32> to vector<8x8xf32>
      %135 = vector.shape_cast %132 : vector<8x8xf32> to vector<1x8x8xf32>
      tpu.vector_store %arg6[%c0_79, %c0_80, %c8_81], %135 {strides = array<i32>} : memref<1x8x32xf32, #tpu.memory_space<vmem>>, vector<1x8x8xf32>,
      %c0_82 = arith.constant 0 : index
      %c2_83 = arith.constant 2 : index
      %136 = vector.load %arg8[%c0_82, %c2_83] : memref<8x4xf32, #tpu.memory_space<vmem>>, vector<8x1xf32>
      %137 = tpu.reciprocal %136 {approx = true} : vector<8x1xf32> -> vector<8x1xf32>
      %c0_84 = arith.constant 0 : index
      %c16_85 = arith.constant 16 : index
      %138 = vector.load %arg9[%c0_84, %c16_85] : memref<8x32xf32, #tpu.memory_space<vmem>>, vector<8x8xf32>
      %139 = vector.broadcast %137 : vector<8x1xf32> to vector<8x8xf32>
      %140 = arith.mulf %138, %139 : vector<8x8xf32>
      %c0_86 = arith.constant 0 : index
      %c0_87 = arith.constant 0 : index
      %c16_88 = arith.constant 16 : index
      %141 = vector.load %arg6[%c0_86, %c0_87, %c16_88] : memref<1x8x32xf32, #tpu.memory_space<vmem>>, vector<1x8x8xf32>
      %142 = vector.shape_cast %141 : vector<1x8x8xf32> to vector<8x8xf32>
      %143 = vector.shape_cast %140 : vector<8x8xf32> to vector<1x8x8xf32>
      tpu.vector_store %arg6[%c0_86, %c0_87, %c16_88], %143 {strides = array<i32>} : memref<1x8x32xf32, #tpu.memory_space<vmem>>, vector<1x8x8xf32>,
      %c0_89 = arith.constant 0 : index
      %c3_90 = arith.constant 3 : index
      %144 = vector.load %arg8[%c0_89, %c3_90] : memref<8x4xf32, #tpu.memory_space<vmem>>, vector<8x1xf32>
      %145 = tpu.reciprocal %144 {approx = true} : vector<8x1xf32> -> vector<8x1xf32>
      %c0_91 = arith.constant 0 : index
      %c24_92 = arith.constant 24 : index
      %146 = vector.load %arg9[%c0_91, %c24_92] : memref<8x32xf32, #tpu.memory_space<vmem>>, vector<8x8xf32>
      %147 = vector.broadcast %145 : vector<8x1xf32> to vector<8x8xf32>
      %148 = arith.mulf %146, %147 : vector<8x8xf32>
      %c0_93 = arith.constant 0 : index
      %c0_94 = arith.constant 0 : index
      %c24_95 = arith.constant 24 : index
      %149 = vector.load %arg6[%c0_93, %c0_94, %c24_95] : memref<1x8x32xf32, #tpu.memory_space<vmem>>, vector<1x8x8xf32>
      %150 = vector.shape_cast %149 : vector<1x8x8xf32> to vector<8x8xf32>
      %151 = vector.shape_cast %148 : vector<8x8xf32> to vector<1x8x8xf32>
      tpu.vector_store %arg6[%c0_93, %c0_94, %c24_95], %151 {strides = array<i32>} : memref<1x8x32xf32, #tpu.memory_space<vmem>>, vector<1x8x8xf32>,
    } else {
    }
    return
  }
  func.func @transform_0(%arg0: i32, %arg1: i32, %arg2: i32) -> (i32, i32, i32) {
    %c0_i32 = arith.constant 0 : i32
    %c0_i32_0 = arith.constant 0 : i32
    return %arg0, %arg1, %c0_i32 : i32, i32, i32
  }
  func.func @transform_1(%arg0: i32, %arg1: i32, %arg2: i32) -> (i32, i32, i32) {
    %c0_i32 = arith.constant 0 : i32
    %c0_i32_0 = arith.constant 0 : i32
    return %arg0, %arg2, %c0_i32 : i32, i32, i32
  }
  func.func @transform_2(%arg0: i32, %arg1: i32, %arg2: i32) -> (i32, i32, i32) {
    %c0_i32 = arith.constant 0 : i32
    %c0_i32_0 = arith.constant 0 : i32
    return %arg0, %arg2, %c0_i32 : i32, i32, i32
  }
  func.func @transform_3(%arg0: i32, %arg1: i32, %arg2: i32) -> (i32, i32, i32) {
    %c0_i32 = arith.constant 0 : i32
    %c0_i32_0 = arith.constant 0 : i32
    return %arg0, %arg1, %c0_i32 : i32, i32, i32
  }
}

</mosaic_0001>

<bundles_post_ra>
// kernel: multi_head_attention.4
= control target key start
LH: loop header
LB: loop body
LE: loop exit
PB: predicated region body
PF: predicated region fallthrough
CT: control target
= control target key end

     0   :  { %v130_v0 = vmov 0.0   ;;  %vm131_vm0 = vmmov 0   ;;  %vm45_vm1 = vcmask 261120   ;;  %vm98_vm2 = vcmask 257024   ;;  %s170_s1 = inlined_call_operand.vmem [shape: bf16[32,32], index: 1, kind: input, shape index: {}]   ;;  %s171_s0 = inlined_call_operand.vmem [shape: bf16[16,32], index: 0, kind: input, shape index: {}]   ;;  %s172_s2 = inlined_call_operand.vmem [shape: f32[1,32], index: 2, kind: input, shape index: {}]   ;;  %s173_s3 = inlined_call_operand.vmem [shape: bf16[16,32], index: 3, kind: output, shape index: {}]  }
   0x1   :  { %117 = vmatprep.subr.bf16.mxu0 %v130_v0  ;;  %v127_v1 = vld [vmem:[%s170_s1] sm:$0xff]   ;;  %121 = vmatprep.mubr.msk.bf16.mxu0 %vm131_vm0, %v130_v0  ;;  %v128_v2 = vld [vmem:[%s170_s1 + $0x8] sm:$0xff]  }
   0x2   :  { %118 = vmatpush3.bf16.msra.mxu0 %v127_v1  ;;  %v129_v3 = vld [vmem:[%s171_s0] sm:$0xff]  }
   0x3   :  { %119 = vmatprep.subr.bf16.mxu0 %v130_v0  ;;  %v105_v4 = vld [vmem:[%s172_s2] ss:$0 sm:$0xff] }
   0x6   :  { %120 = vmatpush3.bf16.msra.mxu0 %v128_v2 }
   0x9   :  { %122 = vmatmul.mubr.msk.bf16.vlgmr.msra.gmra.mrb[0].mxu0 %vm45_vm1, %v129_v3 }
  0xdc   :  { %v83_v5 = vpop.f32.mrb[0].mxu0 }
  0xdd   :  { %v84_v6 = vadd.f32 %v105_v4, %v83_v5  ;;  %v123_v7 = vpop.f32.mrb[1].mxu0 }
  0xde   :  { %v86_v8 = vpop.f32.mrb[2].mxu0 }
  0xdf   :  { %v112_v9 = vpack.c.bf16 %v84_v6, %v84_v6  ;;  %v87_v10 = vadd.f32 %v105_v4, %v86_v8  ;;  %v124_v11 = vpop.f32.mrb[3].mxu0 }
  0xe1   :  { %99 = vst.msk [vmem:[%s173_s3] sm:$0xf] %vm98_vm2, %v112_v9  ;;  %v113_v12 = vpack.c.bf16 %v87_v10, %v87_v10 }
  0xe3   :  { %100 = vst.msk [vmem:[%s173_s3 + $0x4] sm:$0xf] %vm98_vm2, %v113_v12 }

// kernel: multi_head_attention.7
= control target key start
LH: loop header
LB: loop body
LE: loop exit
PB: predicated region body
PF: predicated region fallthrough
CT: control target
= control target key end

     0   :  { %8 = vsyncpa [#allocation6], 0  ;;  %s1547_s0 = inlined_call_operand.vmem [shape: bf16[2,8,32], index: 0, kind: input, shape index: {}]   ;;  %s1548_s1 = inlined_call_operand.vmem [shape: bf16[2,8,32], index: 1, kind: input, shape index: {}]   ;;  %s1549_s2 = inlined_call_operand.vmem [shape: bf16[2,8,32], index: 2, kind: input, shape index: {}]   ;;  %s1550_s3 = inlined_call_operand.hbm [shape: f32[2,8,32], index: 3, kind: output, shape index: {}]  }
   0x1   :  { %10 = vsyncpa [#allocation6 + $0x1], 0  ;;  %s1284_s12 = smov 0   ;;  %s1286_s13 = smov 0  }
   0x2   :  { %s1288_s14 = smov 0   ;;  %s1290_s15 = smov 0  }
   0x3   :  { %s1292_s16 = smov 0   ;;  %s1294_s17 = smov 0  }
   0x4 LB: > { %s981_s18 = sadd.s32 4294967295, %s1248_s17   ;;  %s982_s19 = sadd.s32 4294967294, %s1248_s17   ;;  %s1248_s17 = sphi %s1294_s17, %s16_s17   ;;  %s1244_s16 = sphi %s1292_s16, %s1557_s16   ;;  %s1240_s15 = sphi %s1290_s15, %s1556_s15   ;;  %s1236_s14 = sphi %s1288_s14, %s1555_s14   ;;  %s1232_s13 = sphi %s1286_s13, %s1554_s13   ;;  %s1228_s12 = sphi %s1284_s12, %s1553_s12  }
   0x5   : > { %s35_s20 = sadd.s32 1, %s1244_s16  ;;  %s128_s21 = sadd.s32 1, %s1236_s14 }
   0x6   : > { %p37_p0 = scmp.ge.s32.totalorder %s35_s20, 2  ;;  %p138_p1 = scmp.ne.s32.totalorder %s1236_s14, %s1232_s13 }
   0x7   : > { %p139_p2 = scmp.eq.s32.totalorder %s981_s18, 1  ;;  %p144_p3 = scmp.ne.s32.totalorder %s1232_s13, %s1228_s12 }
   0x8   : > { %s1559_s20 = smov (%p37_p0, %s35_s20), 0  ;;  %p145_p5 = scmp.eq.s32.totalorder %s982_s19, 1 }
   0x9   : > { %p1324_p4 = por %p139_p2, %p138_p1  ;;  %s123_s23 = ssub.s32 %s1244_s16, %s1559_s20 }
   0xa   : > { %p985_p6 = scmp.ge.s32.totalorder %s1248_s17, 1  ;;  %p126_p7 = scmp.eq.s32.totalorder %s123_s23, 0 }
   0xb   : > { %p1331_p8 = por %p145_p5, %p144_p3  ;;  %p193_p9 = scmp.lt.s32.totalorder %s1248_s17, 3 }
   0xc   : > { %s1337_s25 = scalar_select %p126_p7, %s1236_s14, %s128_s21  }
   0xd   : > { %p194_p10 = pnand %p985_p6, %p193_p9 }
   0xe   : > { %p233_p11 = scmp.lt.s32.totalorder (!%p194_p10), %s1240_s15, 1  ;;  %v1250_v0 = vmov (!%p194_p10), 0.0   ;;  %vm1251_vm0 = vmmov (!%p194_p10), 0   ;;  %vm267_vm1 = vcmask (!%p194_p10), 64512   ;;  %vm259_vm2 = vcmask (!%p194_p10), 31744   ;;  %s1254_s7 = smov (!%p194_p10), 120  }
   0xf   : > { %197 = sbr.rel (%p194_p10) target bundleno = 1435 (0x59b), region = 32  ;;  %1021 = vmatprep.subr.bf16.mxu0 (!%p194_p10), %v1250_v0  ;;  %1023 = vmatprep.mubr.msk.bf16.mxu0 (!%p194_p10), %vm1251_vm0, %v1250_v0  ;;  %v1252_v4 = vmov (!%p194_p10), -1e+30   ;;  %261 = vst.msk [vmem:[#allocation3] sm:$0xff] (!%p194_p10), %vm259_vm2, %v1250_v0  ;;  %v1253_v10 = vmov (!%p194_p10), 0   ;;  %s1255_s8 = smov (!%p194_p10), 112  }
  0x10   : > { %1027 = vmatprep.subr.bf16.mxu1 (!%p194_p10), %v1250_v0  ;;  %1029 = vmatprep.mubr.msk.bf16.mxu1 (!%p194_p10), %vm1251_vm0, %v1250_v0  ;;  %260 = vst.msk [vmem:[#allocation2] sm:$0xff] (!%p194_p10), %vm259_vm2, %v1252_v4  ;;  %s1256_s9 = smov (!%p194_p10), 104   ;;  %vm336_vm3 = vcmask (!%p194_p10), 7168   ;;  %vm350_vm4 = vcmask (!%p194_p10), 1043456   ;;  %v1257_v50 = vmov (!%p194_p10), 1   ;;  %v1258_v53 = vmov (!%p194_p10), 2  }
  0x11   : > { %1137 = vset.pattern.permute.xlu0 (!%p194_p10), %v1253_v10  ;;  %1138 = vset.pattern.permute.xlu1 (!%p194_p10), %v1257_v50  ;;  %vm474_vm5 = vcmask (!%p194_p10), 15368   ;;  %v1259_v60 = vmov (!%p194_p10), 3   ;;  %vm262_vm6 = vcmask (!%p194_p10), 261120   ;;  %vm615_vm7 = vcmask (!%p194_p10), 23568   ;;  %s1260_s19 = smov (!%p194_p10), 8   ;;  %s1261_s21 = smov (!%p194_p10), 16  }
  0x12   : > { %263 = vst.msk [vmem:[#allocation4] sm:$0xff] (!%p194_p10), %vm262_vm6, %v1250_v0  ;;  %vm753_vm8 = vcmask (!%p194_p10), 31768   ;;  %s1262_s23 = smov (!%p194_p10), 24   ;;  %vm541_vm9 = vcmask (!%p194_p10), 130112   ;;  %vm679_vm10 = vcmask (!%p194_p10), 195712   ;;  %vm817_vm11 = vcmask (!%p194_p10), 261312  }
  0x13   : > { %s1002_s28 = sshll.u32 (!%p194_p10), %s1240_s15, 7 }
  0x16   : > { %s234_s26 = scalar_select %p233_p11, %s1240_s15, 1 }
  0x17   : > { %v1371_v13 = vld [vmem:[#allocation2] sm:$0xff] }
  0x18   : > { %s1347_s27 = sshll.u32 %s234_s26, 2  ;;  %s230_s26 = sand.u32 1, %s1232_s13  }
  0x19   : > { %s246_s30 = scalar_lea.vmem %s1548_s1, %s1347_s27  ;;  %s239_s6 = scalar_lea.vmem %s1547_s0, %s1347_s27 }
  0x1a   : > { %v265_v1 = vld [vmem:[%s246_s30] sm:$0xf]  ;;  %s253_s18 = scalar_lea.vmem %s1549_s2, %s1347_s27  ;;  %s986_s27 = sshll.u32 %s230_s26, 3 }
  0x1b   : > { %v272_v2 = vsel %vm267_vm1, %v265_v1, 0  ;;  %v264_v3 = vld [vmem:[%s239_s6] sm:$0xf]  ;;  %v993_v11 = vcombine.low %v265_v1, %v265_v1  ;;  %s232_s29 = scalar_lea.vmem [#allocation5], %s986_s27  ;;  %s1498_s6 = scalar_lea.hbm %s1550_s3, %s1002_s28 }
  0x1c   : > { %1022 = vmatpush3.bf16.xpose.msra.mxu0 %v272_v2  ;;  %v992_v12 = vcombine.low %v264_v3, %v264_v3  ;;  %v266_v17 = vld [vmem:[%s253_s18] sm:$0xf]  ;;  %s877_s30 = sshll.u32 %s232_s29, 4  ;;  %s863_s15 = scalar_lea.sflag [#allocation6], %s230_s26  ;;  %s1500_s30 = int_to_ptr.vmem [resolvable:$true] %s877_s30 }
  0x1d   : > { %1039 = vmatprep.subr.bf16.mxu0 %v1250_v0  ;;  %404 = vrot.lane.b32.xlu1 %v993_v11, %s1254_s7  ;;  %v352_v18 = vsel %vm350_vm4, %v266_v17, 0  ;;  %v995_v58 = vcombine.low %v266_v17, %v266_v17 }
  0x1e   : > { %1028 = vmatpush3.bf16.msra.mxu1 %v352_v18 }
  0x1f   : > { %1033 = vmatprep.subr.bf16.mxu1 %v1250_v0 }
  0x21   : > { %399 = vrot.lane.b32.xlu1 %v992_v12, %s1254_s7 }
  0x23   : > { %1024 = vmatmul.mubr.msk.bf16.vlgmr.msra.gmra.mrb[0].mxu0 %vm267_vm1, %v264_v3 }
  0x24   : > { %1041 = vmatprep.mubr.msk.bf16.mxu0 %vm1251_vm0, %v1250_v0 }
  0x25   : > { %545 = vrot.lane.b32.xlu1 %v993_v11, %s1255_s8 }
  0x29   : > { %543 = vrot.lane.b32.xlu1 %v992_v12, %s1255_s8 }
  0x2d   : > { %683 = vrot.lane.b32.xlu1 %v993_v11, %s1256_s9 }
  0x31   : > { %681 = vrot.lane.b32.xlu1 %v992_v12, %s1256_s9 }
  0x8f   : > { %v405_v22 = vpop.permute.xlu1 %404 }
  0x90   : > { %v410_v25 = vsel %vm267_vm1, %v405_v22, 0 }
  0x93   : > { %v400_v23 = vpop.permute.xlu1 %399 }
  0x97   : > { %v546_v27 = vpop.permute.xlu1 %545 }
  0x98   : > { %v551_v29 = vsel %vm267_vm1, %v546_v27, 0 }
  0x9b   : > { %v544_v28 = vpop.permute.xlu1 %543 }
  0x9f   : > { %v684_v30 = vpop.permute.xlu1 %683 }
  0xa0   : > { %v689_v31 = vsel %vm267_vm1, %v684_v30, 0 }
  0xa3   : > { %v682_v32 = vpop.permute.xlu1 %681 }
  0xf6   : > { %v308_v5 = vpop.f32.mrb[0].mxu0 }
  0xf7   : > { %v1025_v6 = vpop.f32.mrb[1].mxu0  ;;  %v315_v7 = vsel %vm267_vm1, %v308_v5, -inf }
  0xf8   : > { %316 = vmax.xlane.f32.xlu0 %v315_v7  ;;  %v311_v8 = vpop.f32.mrb[2].mxu0 }
  0xf9   : > { %v1026_v9 = vpop.f32.mrb[3].mxu0 }
 0x185   : > { %v317_v14 = vpop.xlane.xlu0 %316 }
 0x186   : > { %v1374_v15 = vmax.f32 %v1371_v13, %v317_v14 }
 0x188   : > { %v319_v16 = vsub.f32 %v1371_v13, %v1374_v15  ;;  %338 = vst.msk [vmem:[#allocation2] sm:$0xff] %vm336_vm3, %v1374_v15  ;;  %324 = vperm.xlu0 %1137, %v1374_v15  }
 0x18a   : > { %v320_v57 = vmul.f32 1.442695, %v319_v16 }
 0x18c   : > { %1139 = vset.pattern.permute.xlu0 %v1258_v53 }
 0x18f   : > { %v452_v55 = vld [vmem:[#allocation2] sm:$0xff] }
 0x207   : > { %v325_v19 = vpop.permute.xlu0 %324 }
 0x208   : > { %v327_v20 = vsub.f32 %v308_v5, %v325_v19  ;;  %v339_v19 = vld [vmem:[#allocation4] sm:$0xff] }
 0x20a   : > { %v328_v21 = vmul.f32 1.442695, %v327_v20 }
 0x20c   : > { %1152 = vpow2.f32 %v328_v21 }
 0x20d   : > { %1154 = vpow2.f32 %v320_v57 }
 0x216   : > { %v1387_v24 = vpop.eup %1152 }
 0x217   : > { %v346_v26 = vpack.c.bf16 %v1387_v24, %v1387_v24  ;;  %v1434_v2 = vpop.eup %1154  ;;  %v332_v7 = vsel %vm267_vm1, %v1387_v24, 0.0 }
 0x219   : > { %1030 = vmatmul.mubr.msk.bf16.vlgmr.msra.gmra.mrb[0].mxu1 %vm267_vm1, %v346_v26 }
 0x21a   : > { %1034 = vmatpush3.bf16.xpose.msra.mxu1 %v410_v25  ;;  %1035 = vmatprep.mubr.msk.bf16.mxu1 %vm1251_vm0, %v1250_v0 }
 0x21b   : > { %1045 = vmatprep.subr.bf16.mxu1 %v1250_v0 }
 0x221   : > { %1036 = vmatmul.mubr.msk.bf16.vlgmr.msra.gmra.mrb[4].mxu1 %vm267_vm1, %v400_v23 }
 0x222   : > { %1046 = vmatpush3.bf16.xpose.msra.mxu1 %v551_v29  ;;  %1047 = vmatprep.mubr.msk.bf16.mxu1 %vm1251_vm0, %v1250_v0 }
 0x223   : > { %1057 = vmatprep.subr.bf16.mxu1 %v1250_v0 }
 0x229   : > { %1048 = vmatmul.mubr.msk.bf16.vlgmr.msra.gmra.mrb[8].mxu1 %vm267_vm1, %v544_v28 }
 0x22a   : > { %1058 = vmatpush3.bf16.xpose.msra.mxu1 %v689_v31  ;;  %1059 = vmatprep.mubr.msk.bf16.mxu1 %vm1251_vm0, %v1250_v0 }
 0x231   : > { %1060 = vmatmul.mubr.msk.bf16.vlgmr.msra.gmra.mrb[12].mxu1 %vm267_vm1, %v682_v32 }
 0x2ec   : > { %v1406_v33 = vpop.f32.mrb[0].mxu1 }
 0x2ed   : > { %v1031_v34 = vpop.f32.mrb[1].mxu1 }
 0x2ee   : > { %v391_v35 = vpop.f32.mrb[2].mxu1 }
 0x2ef   : > { %v1032_v36 = vpop.f32.mrb[3].mxu1 }
 0x2f4   : > { %v1408_v37 = vpop.f32.mrb[4].mxu1 }
 0x2f5   : > { %v1037_v38 = vpop.f32.mrb[5].mxu1  ;;  %v453_v39 = vsel %vm267_vm1, %v1408_v37, -inf }
 0x2f6   : > { %454 = vmax.xlane.f32.xlu1 %v453_v39  ;;  %v449_v40 = vpop.f32.mrb[6].mxu1 }
 0x2f7   : > { %v1038_v41 = vpop.f32.mrb[7].mxu1 }
 0x2f8   : > { %v330_v41 = vld [vmem:[#allocation3] sm:$0xff] }
 0x2fc   : > { %v1412_v42 = vpop.f32.mrb[8].mxu1 }
 0x2fd   : > { %v1049_v43 = vpop.f32.mrb[9].mxu1  ;;  %v594_v44 = vsel %vm267_vm1, %v1412_v42, -inf }
 0x2fe   : > { %595 = vmax.xlane.f32.xlu0 %v594_v44  ;;  %v590_v45 = vpop.f32.mrb[10].mxu1 }
 0x2ff   : > { %v1050_v46 = vpop.f32.mrb[11].mxu1 }
 0x304   : > { %v1416_v47 = vpop.f32.mrb[12].mxu1 }
 0x305   : > { %v1061_v48 = vpop.f32.mrb[13].mxu1  ;;  %v732_v49 = vsel %vm267_vm1, %v1416_v47, -inf }
 0x306   : > { %v728_v51 = vpop.f32.mrb[14].mxu1  ;;  %733 = vmax.xlane.f32.xlu1 %v732_v49 }
 0x307   : > { %v1062_v52 = vpop.f32.mrb[15].mxu1 }
 0x383   : > { %v455_v54 = vpop.xlane.xlu1 %454 }
 0x384   : > { %v456_v56 = vmax.f32 %v452_v55, %v455_v54 }
 0x386   : > { %v457_v59 = vsub.f32 %v452_v55, %v456_v56  ;;  %476 = vst.msk [vmem:[#allocation2] sm:$0xff] %vm474_vm5, %v456_v56  ;;  %462 = vperm.xlu1 %1138, %v456_v56  }
 0x388   : > { %v458_v8 = vmul.f32 1.442695, %v457_v59 }
 0x38a   : > { %488 = vrot.lane.b32.xlu1 %v995_v58, %s1254_s7  ;;  %1156 = vpow2.f32 %v458_v8  ;;  %s1170_s7 = scalar_lea.vmem %s1500_s30, 128 }
 0x38b   : > { %1140 = vset.pattern.permute.xlu1 %v1259_v60  ;;  %v596_v61 = vpop.xlane.xlu0 %595  ;;  %p1171_p12 = scmp.ne.s32.totalorder %s1500_s30, %s1170_s7 }
 0x38d   : > { %v1428_v62 = vld [vmem:[#allocation2] sm:$0xff]  ;;  %p1172_p13 = pnand %p1171_p12, %p1324_p4 }
 0x38e   : > { %v597_v63 = vmax.f32 %v1428_v62, %v596_v61 }
 0x38f   : > { %p1173_p0 = pneg %p1172_p13 }
 0x390   : > { %v598_v1 = vsub.f32 %v1428_v62, %v597_v63  ;;  %617 = vst.msk [vmem:[#allocation2] sm:$0xff] %vm615_vm7, %v597_v63  ;;  %603 = vperm.xlu0 %1139, %v597_v63  }
 0x392   : > { %v599_v35 = vmul.f32 1.442695, %v598_v1 }
 0x393   : > { %v734_v3 = vpop.xlane.xlu1 %733 }
 0x394   : > { %1141 = vset.pattern.permute.xlu0 %v1253_v10  ;;  %v1157_v9 = vpop.eup %1156 }
 0x395   : > { %342 = vperm.xlu0 %1141, %v1434_v2  }
 0x397   : > { %v1438_v4 = vld [vmem:[#allocation2] sm:$0xff] }
 0x398   : > { %v1441_v5 = vmax.f32 %v1438_v4, %v734_v3 }
 0x399   : > { %1144 = vset.pattern.permute.xlu0 %v1259_v60 }
 0x39a   : > { %v736_v6 = vsub.f32 %v1438_v4, %v1441_v5  ;;  %755 = vst.msk [vmem:[#allocation2] sm:$0xff] %vm753_vm8, %v1441_v5  ;;  %741 = vperm.xlu1 %1140, %v1441_v5  }
 0x39c   : > { %v737_v48 = vmul.f32 1.442695, %v736_v6 }
 0x39e   : > { %626 = vrot.lane.b32.xlu1 %v995_v58, %s1255_s8  ;;  %s1263_s8 = smov [#allocation5]  }
 0x39f   : > { %1142 = vset.pattern.permute.xlu1 %v1257_v50 }
 0x3a2   : > { %764 = vrot.lane.b32.xlu1 %v995_v58, %s1256_s9  ;;  %s1174_s9 = sshll.u32 %s1263_s8, 4  ;;  %s1175_s9 = int_to_ptr.vmem [resolvable:$false] %s1174_s9 }
 0x3a3   : > { %s1176_s10 = scalar_lea.vmem %s1175_s9, 256  ;;  %p1177_p1 = scmp.lt.s32.totalorder %s1500_s30, %s1175_s9 }
 0x3a4   : > { %p1178_p2 = scmp.lt.s32.totalorder %s1176_s10, %s1170_s7 }
 0x3a6   : > { %p1179_p3 = por %p1178_p2, %p1177_p1 }
 0x3a8   : > { %p1180_p5 = pnand %p1179_p3, %p1173_p0 }
 0x3c6   : > { %333 = vadd.xlane.f32.xlu1 %v332_v7 }
 0x3d7   : > { %480 = vperm.xlu1 %1142, %v1157_v9  }
 0x3db   : > { %1143 = vset.pattern.permute.xlu1 %v1258_v53 }
 0x405   : > { %v463_v11 = vpop.permute.xlu1 %462 }
 0x406   : > { %v465_v12 = vsub.f32 %v1408_v37, %v463_v11 }
 0x408   : > { %v466_v13 = vmul.f32 1.442695, %v465_v12 }
 0x409   : > { %v489_v14 = vpop.permute.xlu1 %488 }
 0x40a   : > { %1158 = vpow2.f32 %v466_v13  ;;  %v494_v15 = vsel %vm350_vm4, %v489_v14, 0 }
 0x40b   : > { %1040 = vmatpush3.bf16.msra.mxu0 %v494_v15 }
 0x40c   : > { %1051 = vmatprep.subr.bf16.mxu0 %v1250_v0 }
 0x40f   : > { %v604_v16 = vpop.permute.xlu0 %603 }
 0x410   : > { %v606_v17 = vsub.f32 %v1412_v42, %v604_v16  ;;  %v331_v42 = vmul.f32 %v1434_v2, %v330_v41 }
 0x412   : > { %v607_v18 = vmul.f32 1.442695, %v606_v17 }
 0x414   : > { %v1159_v20 = vpop.eup %1158  ;;  %1160 = vpow2.f32 %v607_v18  ;;  %v343_v21 = vpop.permute.xlu0 %342 }
 0x415   : > { %v345_v22 = vmul.f32 %v343_v21, %v339_v19  ;;  %v470_v23 = vsel %vm267_vm1, %v1159_v20, 0.0  ;;  %v484_v24 = vpack.c.bf16 %v1159_v20, %v1159_v20 }
 0x416   : > { %471 = vadd.xlane.f32.xlu0 %v470_v23 }
 0x417   : > { %v394_v25 = vadd.f32 %v1406_v33, %v345_v22  ;;  %1042 = vmatmul.mubr.msk.bf16.vlgmr.msra.gmra.mrb[4].mxu0 %vm267_vm1, %v484_v24 }
 0x418   : > { %1053 = vmatprep.mubr.msk.bf16.mxu0 %vm1251_vm0, %v1250_v0 }
 0x419   : > { %395 = vst.msk [vmem:[#allocation4] sm:$0xff] %vm267_vm1, %v394_v25  ;;  %v742_v26 = vpop.permute.xlu1 %741 }
 0x41a   : > { %v744_v27 = vsub.f32 %v1416_v47, %v742_v26 }
 0x41c   : > { %v745_v28 = vmul.f32 1.442695, %v744_v27 }
 0x41d   : > { %v627_v29 = vpop.permute.xlu1 %626 }
 0x41e   : > { %v1161_v30 = vpop.eup %1160  ;;  %1162 = vpow2.f32 %v745_v28  ;;  %v632_v31 = vsel %vm350_vm4, %v627_v29, 0 }
 0x41f   : > { %1052 = vmatpush3.bf16.msra.mxu0 %v632_v31  ;;  %v611_v32 = vsel %vm267_vm1, %v1161_v30, 0.0  ;;  %v625_v33 = vpack.c.bf16 %v1161_v30, %v1161_v30  ;;  %1164 = vpow2.f32 %v599_v35 }
 0x420   : > { %612 = vadd.xlane.f32.xlu1 %v611_v32  ;;  %1063 = vmatprep.subr.bf16.mxu0 %v1250_v0  ;;  %1166 = vpow2.f32 %v737_v48  ;;  %v477_v12 = vld [vmem:[#allocation4] sm:$0xff] }
 0x421   : > { %v765_v34 = vpop.permute.xlu1 %764 }
 0x422   : > { %1054 = vmatmul.mubr.msk.bf16.vlgmr.msra.gmra.mrb[8].mxu0 %vm267_vm1, %v625_v33  ;;  %v770_v36 = vsel %vm350_vm4, %v765_v34, 0 }
 0x423   : > { %1064 = vmatpush3.bf16.msra.mxu0 %v770_v36  ;;  %1065 = vmatprep.mubr.msk.bf16.mxu0 %vm1251_vm0, %v1250_v0 }
 0x428   : > { %v1163_v37 = vpop.eup %1162 }
 0x429   : > { %v749_v38 = vsel %vm267_vm1, %v1163_v37, 0.0  ;;  %v763_v39 = vpack.c.bf16 %v1163_v37, %v1163_v37  ;;  %v1165_v40 = vpop.eup %1164 }
 0x42a   : > { %750 = vadd.xlane.f32.xlu0 %v749_v38  ;;  %v1167_v55 = vpop.eup %1166 }
 0x42b   : > { %1066 = vmatmul.mubr.msk.bf16.vlgmr.msra.gmra.mrb[12].mxu0 %vm267_vm1, %v763_v39 }
 0x431   : > { %621 = vperm.xlu1 %1143, %v1165_v40  }
 0x435   : > { %1145 = vset.pattern.permute.xlu1 %v1253_v10 }
 0x453   : > { %v334_v43 = vpop.xlane.xlu1 %333 }
 0x454   : > { %v335_v44 = vadd.f32 %v334_v43, %v331_v42 }
 0x456   : > { %337 = vst.msk [vmem:[#allocation3] sm:$0xff] %vm336_vm3, %v335_v44 }
 0x457   : > { %v481_v49 = vpop.permute.xlu1 %480 }
 0x458   : > { %v483_v13 = vmul.f32 %v481_v49, %v477_v12 }
 0x45d   : > { %v468_v0 = vld [vmem:[#allocation3] sm:$0xff] }
 0x45e   : > { %v469_v45 = vmul.f32 %v1157_v9, %v468_v0 }
 0x4a3   : > { %v472_v46 = vpop.xlane.xlu0 %471 }
 0x4a4   : > { %v473_v47 = vadd.f32 %v472_v46, %v469_v45 }
 0x4a6   : > { %475 = vst.msk [vmem:[#allocation3] sm:$0xff] %vm474_vm5, %v473_v47 }
 0x4ad   : > { %v609_v51 = vld [vmem:[#allocation3] sm:$0xff]  ;;  %v613_v52 = vpop.xlane.xlu1 %612 }
 0x4ae   : > { %v610_v10 = vmul.f32 %v1165_v40, %v609_v51 }
 0x4b0   : > { %v614_v54 = vadd.f32 %v613_v52, %v610_v10 }
 0x4b1   : > { %v622_v16 = vpop.permute.xlu1 %621 }
 0x4b2   : > { %616 = vst.msk [vmem:[#allocation3] sm:$0xff] %vm615_vm7, %v614_v54 }
 0x4b7   : > { %v751_v58 = vpop.xlane.xlu0 %750 }
 0x4b9   : > { %v747_v56 = vld [vmem:[#allocation3] sm:$0xff] }
 0x4ba   : > { %v748_v57 = vmul.f32 %v1167_v55, %v747_v56 }
 0x4bc   : > { %v752_v59 = vadd.f32 %v751_v58, %v748_v57 }
 0x4be   : > { %754 = vst.msk [vmem:[#allocation3] sm:$0xff] %vm753_vm8, %v752_v59 }
 0x4c5   : > { %v822_v61 = vld [vmem:[#allocation3] sm:$0xff] }
 0x4c6   : > { %1168 = vrcp.f32 %v822_v61 }
 0x4d0   : > { %v1169_v62 = vpop.eup %1168 }
 0x4d1   : > { %827 = vperm.xlu1 %1145, %v1169_v62  }
 0x4d5   : > { %1147 = vset.pattern.permute.xlu1 %v1258_v53 }
 0x4d6   : > { %847 = vperm.xlu1 %1147, %v1169_v62  }
 0x4da   : > { %1148 = vset.pattern.permute.xlu1 %v1259_v60 }
 0x4db   : > { %857 = vperm.xlu1 %1148, %v1169_v62  }
 0x4ea   : > { %v530_v63 = vpop.f32.mrb[4].mxu0 }
 0x4eb   : > { %537 = vrot.lane.b32.xlu0 %v530_v63, %s1260_s19  ;;  %v1043_v1 = vpop.f32.mrb[5].mxu0 }
 0x4ec   : > { %v533_v2 = vpop.f32.mrb[6].mxu0 }
 0x4ed   : > { %v1044_v3 = vpop.f32.mrb[7].mxu0 }
 0x4f5   : > { %v668_v4 = vpop.f32.mrb[8].mxu0 }
 0x4f6   : > { %675 = vrot.lane.b32.xlu0 %v668_v4, %s1261_s21  ;;  %v1055_v5 = vpop.f32.mrb[9].mxu0 }
 0x4f7   : > { %v671_v6 = vpop.f32.mrb[10].mxu0 }
 0x4f8   : > { %v1056_v7 = vpop.f32.mrb[11].mxu0 }
 0x4fa   : > { %759 = vperm.xlu0 %1144, %v1167_v55  }
 0x4fe   : > { %v806_v8 = vpop.f32.mrb[12].mxu0  ;;  %1146 = vset.pattern.permute.xlu0 %v1257_v50 }
 0x4ff   : > { %813 = vrot.lane.b32.xlu0 %v806_v8, %s1262_s23  ;;  %v1067_v53 = vpop.f32.mrb[13].mxu0 }
 0x500   : > { %v809_v9 = vpop.f32.mrb[14].mxu0 }
 0x501   : > { %v1068_v11 = vpop.f32.mrb[15].mxu0 }
 0x503   : > { %837 = vperm.xlu0 %1146, %v1169_v62  }
 0x507   : > { %1149 = vset.pattern.permute.xlu0 %v1259_v60 }
 0x550   : > { %v828_v23 = vpop.permute.xlu1 %827 }
 0x555   : > { %v848_v25 = vpop.permute.xlu1 %847 }
 0x55a   : > { %v858_v30 = vpop.permute.xlu1 %857 }
 0x55d   : > { %v538_v14 = vpop.permute.xlu0 %537 }
 0x55e   : > { %v540_v15 = vadd.f32 %v538_v14, %v483_v13 }
 0x560   : > { %542 = vst.msk [vmem:[#allocation4] sm:$0xff] %vm541_vm9, %v540_v15 }
 0x567   : > { %v618_v17 = vld [vmem:[#allocation4] sm:$0xff] }
 0x568   : > { %v624_v18 = vmul.f32 %v622_v16, %v618_v17  ;;  %v676_v50 = vpop.permute.xlu0 %675 }
 0x56a   : > { %v678_v19 = vadd.f32 %v676_v50, %v624_v18 }
 0x56c   : > { %680 = vst.msk [vmem:[#allocation4] sm:$0xff] %vm679_vm10, %v678_v19 }
 0x573   : > { %v756_v21 = vld [vmem:[#allocation4] sm:$0xff] }
 0x579   : > { %v760_v20 = vpop.permute.xlu0 %759 }
 0x57a   : > { %v762_v60 = vmul.f32 %v760_v20, %v756_v21 }
 0x57d   : > { %v814_v22 = vpop.permute.xlu0 %813 }
 0x57e   : > { %v816_v24 = vadd.f32 %v814_v22, %v762_v60 }
 0x580   : > { %818 = vst.msk [vmem:[#allocation4] sm:$0xff] %vm817_vm11, %v816_v24 }
 0x582   : > { %v838_v27 = vpop.permute.xlu0 %837 }
 0x587   : > { %v834_v26 = vld [vmem:[#allocation4] sm:$0xff] }
 0x588   : > { %v840_v28 = vmul.f32 %v838_v27, %v834_v26  ;;  %v830_v29 = vmul.f32 %v834_v26, %v828_v23  ;;  %v850_v31 = vmul.f32 %v848_v25, %v834_v26  ;;  %v860_v32 = vmul.f32 %v858_v30, %v834_v26 }
 0x58a   : > { %831 = vst.msk [vmem:[%s232_s29] sm:$0xff] %vm267_vm1, %v830_v29 }
 0x58b   : > { %841 = vst.msk [vmem:[%s232_s29] sm:$0xff] %vm541_vm9, %v840_v28 }
 0x58c   : > { %851 = vst.msk [vmem:[%s232_s29] sm:$0xff] %vm679_vm10, %v850_v31 }
 0x58d   : > { %861 = vst.msk [vmem:[%s232_s29] sm:$0xff] %vm817_vm11, %v860_v32 }
 0x58e   : > { %1183 = shalt.err (!%p1180_p5)
}
 0x58f   : > { %s1184_s11 = scalar_lea.hbm %s1498_s6, 128  ;;  %s1188_s21 = scalar_lea.hbm %s1550_s3, 256 }
 0x590   : > { %p1185_p6 = scmp.ne.s32.totalorder %s1498_s6, %s1184_s11  ;;  %p1189_p10 = scmp.lt.u32.totalorder %s1498_s6, %s1550_s3 }
 0x591   : > { %p1190_p11 = scmp.lt.u32.totalorder %s1188_s21, %s1184_s11  ;;  %p1192_p13 = scmp.lt.u32.totalorder %s1184_s11, %s1498_s6 }
 0x592   : > { %p1186_p7 = pnand %p1185_p6, %p1324_p4 }
 0x593   : > { %p1191_p12 = por %p1190_p11, %p1189_p10 }
 0x594   : > { %p1187_p9 = pneg %p1186_p7 }
 0x595   : > { %p1193_p0 = por %p1192_p13, %p1191_p12 }
 0x597   : > { %p1194_p1 = pnand %p1193_p0, %p1187_p9 }
 0x599   : > { %1197 = shalt.err (!%p1194_p1)
}
 0x59a   : > { %1069 = dma.vmem_to_hbm [thread:$0]  (%p1324_p4), %s1500_s30, 128, %s1498_s6, %s863_s15  }
 0x59b PF: > { %p1075_p2 = scmp.ge.s32.totalorder %s1248_s17, 2  ;;  %s889_s27 = sand.u32 1, %s1228_s12  }
 0x59c   : > { %s890_s28 = scalar_lea.sflag [#allocation6], %s889_s27 }
 0x59d   : > { %p1072_p3 = pnand %p1075_p2, %p1331_p8 }
 0x59f   : > { %1223 = dma.done.wait (!%p1072_p3), %s890_s28, 128  }
 0x5a0   : > { %1225 = vsyncadd (!%p1072_p3), %s890_s28, 4294967168  ;;  %s16_s17 = sadd.s32 1, %s1248_s17   ;;  %s1553_s12 = smov %s1232_s13 }
 0x5a1   : > { %p13_p5 = scmp.ge.s32.totalorder %s16_s17, 4   ;;  %s1554_s13 = smov %s1236_s14 }
 0x5a2   : > { %s1555_s14 = smov %s1337_s25  ;;  %s1556_s15 = smov %s1244_s16 }
 0x5a3   : > { %s1557_s16 = smov %s1559_s20  ;;  %15 = sbr.rel (!%p13_p5) target bundleno = 4 (0x4), region = 81 }
 0x5aa   :  { %895 = vsyncpa [#allocation6], 1 }
 0x5ab   :  { %897 = vsyncpa [#allocation6 + $0x1], 1 }

</bundles_post_ra>
